<compile_context>
chip_gen: v6e
topology: v6e:2x2x1
jax: 0.10.0
libtpu: 0.0.40
codegen_flags: <defaults>
</compile_context>

<pallas_src>
import functools
import math

import jax
import jax.numpy as jnp
from jax import lax
from jax.experimental import pallas as pl
from jax.experimental.pallas import tpu as pltpu

# ----------------------------- hyperparameters -----------------------------
D_MODEL = 32
DFF = 64
BATCH = 2
SEQ = 8
LN_EPS = 1e-5


def _gelu_exact(x):
    # PyTorch nn.GELU default: exact erf formulation.
    return 0.5 * x * (1.0 + lax.erf(x * (1.0 / math.sqrt(2.0))))


# ----------------------------- Pallas kernel -----------------------------
def ffn_kernel(x_ref, w1_ref, w2_ref, p_ref, out_ref, *, d_model):
    x = x_ref[...]                                                   # [BS, D]

    # Packed per-feature params (one DMA instead of four):
    #   row 0: b1 (full DFF)   rows 1..3: b2 / gamma / beta (first D cols)
    p = p_ref[...]                                                   # [4, F]
    b1 = p[0:1, :]                                                   # [1, F]
    b2 = p[1:2, :d_model]                                            # [1, D]
    gamma = p[2:3, :d_model]                                         # [1, D]
    beta = p[3:4, :d_model]                                          # [1, D]

    h = jnp.dot(x, w1_ref[...], preferred_element_type=jnp.float32) + b1
    h = _gelu_exact(h)                                               # [BS, F]
    y = jnp.dot(h, w2_ref[...], preferred_element_type=jnp.float32) + b2

    # dropout = identity (eval mode); residual connection.
    y = y + x                                                        # [BS, D]

    # LayerNorm over the feature dim.
    mu = jnp.mean(y, axis=-1, keepdims=True)
    var = jnp.mean((y - mu) ** 2, axis=-1, keepdims=True)
    out_ref[...] = (y - mu) * lax.rsqrt(var + LN_EPS) * gamma + beta


# ----------------------------- wrapper -----------------------------
def poswise_ffn(x, w1, b1, w2, b2, gamma, beta):
    """x: [B, S, D]; weights stored as [in, out] (transposed vs nn.Linear)."""
    B, S, D = x.shape
    F = w1.shape[1]
    BS = B * S

    x2 = x.reshape(BS, D)  # contiguous reshape: bitcast, no copy

    # Pack the four small vectors into one [4, F] slab (single input DMA).
    params = jnp.zeros((4, F), jnp.float32)
    params = params.at[0, :].set(b1)
    params = params.at[1, :D].set(b2)
    params = params.at[2, :D].set(gamma)
    params = params.at[3, :D].set(beta)

    kern = functools.partial(ffn_kernel, d_model=D)

    cost = pl.CostEstimate(
        flops=2 * 2 * BS * D * F,                 # two matmuls
        transcendentals=BS * F + BS,              # erf + rsqrt
        bytes_accessed=4 * (BS * D + D * F + F * D + 4 * F + BS * D),
    )

    y2 = pl.pallas_call(
        kern,
        out_shape=jax.ShapeDtypeStruct((BS, D), jnp.float32),
        grid=(1,),
        in_specs=[
            pl.BlockSpec((BS, D), lambda i: (0, 0)),   # activations
            pl.BlockSpec((D, F), lambda i: (0, 0)),    # w1
            pl.BlockSpec((F, D), lambda i: (0, 0)),    # w2
            pl.BlockSpec((4, F), lambda i: (0, 0)),    # packed b1/b2/gamma/beta
        ],
        out_specs=pl.BlockSpec((BS, D), lambda i: (0, 0)),
        compiler_params=pltpu.CompilerParams(
            dimension_semantics=("arbitrary",)),
        cost_estimate=cost,
    )(x2, w1, w2, params)

    return y2.reshape(B, S, D)  # contiguous reshape: bitcast, no copy


# ----------------------------- reference (pure JAX) -----------------------------
def poswise_ffn_ref(x, w1, b1, w2, b2, gamma, beta):
    h = _gelu_exact(x @ w1 + b1)
    out = h @ w2 + b2 + x                          # dropout = identity
    mu = out.mean(-1, keepdims=True)
    var = ((out - mu) ** 2).mean(-1, keepdims=True)
    return (out - mu) * lax.rsqrt(var + LN_EPS) * gamma + beta


# ----------------------------- main -----------------------------
if __name__ == "__main__":
    key = jax.random.PRNGKey(0)
    kx, kw1, kb1, kw2, kb2, kg, kb = jax.random.split(key, 7)

    x = jax.random.normal(kx, (BATCH, SEQ, D_MODEL), jnp.float32)
    w1 = jax.random.normal(kw1, (D_MODEL, DFF), jnp.float32) * 0.05
    b1 = jax.random.normal(kb1, (DFF,), jnp.float32) * 0.05
    w2 = jax.random.normal(kw2, (DFF, D_MODEL), jnp.float32) * 0.05
    b2 = jax.random.normal(kb2, (D_MODEL,), jnp.float32) * 0.05
    gamma = 1.0 + 0.1 * jax.random.normal(kg, (D_MODEL,), jnp.float32)
    beta = 0.1 * jax.random.normal(kb, (D_MODEL,), jnp.float32)

    fwd = jax.jit(poswise_ffn)
    y = fwd(x, w1, b1, w2, b2, gamma, beta)
    jax.block_until_ready(y)

    y_ref = poswise_ffn_ref(x, w1, b1, w2, b2, gamma, beta)

    assert y.shape == (BATCH, SEQ, D_MODEL)
    assert bool(jnp.all(jnp.isfinite(y)))
    assert bool(jnp.allclose(y, y_ref, atol=1e-5, rtol=1e-5))
    # TODO(synk): training-mode dropout (p=rate) not implemented; forward is
    # eval-mode (dropout = identity), matching the deterministic reference.
    print("KERNEL_OK")
</pallas_src>

<mosaic_0001>
module attributes {stable_mosaic.version = 11 : i64} {
  func.func @ffn_kernel(%arg0: i32, %arg1: memref<16x32xf32, #tpu.memory_space<vmem>>, %arg2: memref<32x64xf32, #tpu.memory_space<vmem>>, %arg3: memref<64x32xf32, #tpu.memory_space<vmem>>, %arg4: memref<4x64xf32, #tpu.memory_space<vmem>>, %arg5: memref<16x32xf32, #tpu.memory_space<vmem>>) attributes {dimension_semantics = [#tpu.dimension_semantics<arbitrary>], iteration_bounds = array<i64: 1>, scalar_prefetch = 0 : i64, scratch_operands = 0 : i64, tpu.core_type = #tpu.core_type<tc>, window_params = [{pipeline_mode = #tpu.pipeline_mode<synchronous>, transform_indices = @transform_0, window_bounds = array<i64: 16, 32>}, {pipeline_mode = #tpu.pipeline_mode<synchronous>, transform_indices = @transform_1, window_bounds = array<i64: 32, 64>}, {pipeline_mode = #tpu.pipeline_mode<synchronous>, transform_indices = @transform_2, window_bounds = array<i64: 64, 32>}, {pipeline_mode = #tpu.pipeline_mode<synchronous>, transform_indices = @transform_3, window_bounds = array<i64: 4, 64>}, {pipeline_mode = #tpu.pipeline_mode<synchronous>, transform_indices = @transform_4, window_bounds = array<i64: 16, 32>}]} {
    %c0 = arith.constant 0 : index
    %c0_0 = arith.constant 0 : index
    %0 = vector.load %arg1[%c0, %c0_0] : memref<16x32xf32, #tpu.memory_space<vmem>>, vector<16x32xf32>
    %c0_1 = arith.constant 0 : index
    %c0_2 = arith.constant 0 : index
    %1 = vector.load %arg4[%c0_1, %c0_2] : memref<4x64xf32, #tpu.memory_space<vmem>>, vector<4x64xf32>
    %2 = vector.extract_strided_slice %1 {offsets = [0, 0], sizes = [1, 64], strides = [1, 1]} : vector<4x64xf32> to vector<1x64xf32>
    %3 = vector.extract_strided_slice %1 {offsets = [1, 0], sizes = [1, 32], strides = [1, 1]} : vector<4x64xf32> to vector<1x32xf32>
    %4 = vector.extract_strided_slice %1 {offsets = [2, 0], sizes = [1, 32], strides = [1, 1]} : vector<4x64xf32> to vector<1x32xf32>
    %5 = vector.extract_strided_slice %1 {offsets = [3, 0], sizes = [1, 32], strides = [1, 1]} : vector<4x64xf32> to vector<1x32xf32>
    %c0_3 = arith.constant 0 : index
    %c0_4 = arith.constant 0 : index
    %6 = vector.load %arg2[%c0_3, %c0_4] : memref<32x64xf32, #tpu.memory_space<vmem>>, vector<32x64xf32>
    %cst = arith.constant dense<0.000000e+00> : vector<16x64xf32>
    %7 = tpu.matmul %0, %6, %cst {dimension_numbers = #tpu.dot_dimension_numbers<[1], [0], [0], [1], [0, 0, 1, 1], [], []>} : vector<16x32xf32>, vector<32x64xf32>, vector<16x64xf32> -> vector<16x64xf32>
    %8 = vector.broadcast %2 : vector<1x64xf32> to vector<16x64xf32>
    %9 = arith.addf %7, %8 : vector<16x64xf32>
    %cst_5 = arith.constant 5.000000e-01 : f32
    %10 = vector.broadcast %cst_5 : f32 to vector<16x64xf32>
    %11 = arith.mulf %10, %9 : vector<16x64xf32>
    %cst_6 = arith.constant 0.707106769 : f32
    %12 = vector.broadcast %cst_6 : f32 to vector<16x64xf32>
    %13 = arith.mulf %9, %12 : vector<16x64xf32>
    %14 = math.erf %13 : vector<16x64xf32>
    %cst_7 = arith.constant 1.000000e+00 : f32
    %15 = vector.broadcast %cst_7 : f32 to vector<16x64xf32>
    %16 = arith.addf %15, %14 : vector<16x64xf32>
    %17 = arith.mulf %11, %16 : vector<16x64xf32>
    %c0_8 = arith.constant 0 : index
    %c0_9 = arith.constant 0 : index
    %18 = vector.load %arg3[%c0_8, %c0_9] : memref<64x32xf32, #tpu.memory_space<vmem>>, vector<64x32xf32>
    %cst_10 = arith.constant dense<0.000000e+00> : vector<16x32xf32>
    %19 = tpu.matmul %17, %18, %cst_10 {dimension_numbers = #tpu.dot_dimension_numbers<[1], [0], [0], [1], [0, 0, 1, 1], [], []>} : vector<16x64xf32>, vector<64x32xf32>, vector<16x32xf32> -> vector<16x32xf32>
    %20 = vector.broadcast %3 : vector<1x32xf32> to vector<16x32xf32>
    %21 = arith.addf %19, %20 : vector<16x32xf32>
    %22 = arith.addf %21, %0 : vector<16x32xf32>
    %cst_11 = arith.constant dense<0.000000e+00> : vector<16xf32>
    %23 = vector.multi_reduction <add>, %22, %cst_11 [1] : vector<16x32xf32> to vector<16xf32>
    %24 = vector.shape_cast %23 : vector<16xf32> to vector<16x1xf32>
    %cst_12 = arith.constant 3.200000e+01 : f32
    %25 = vector.broadcast %cst_12 : f32 to vector<16x1xf32>
    %26 = arith.divf %24, %25 : vector<16x1xf32>
    %27 = vector.broadcast %26 : vector<16x1xf32> to vector<16x32xf32>
    %28 = arith.subf %22, %27 : vector<16x32xf32>
    %29 = arith.mulf %28, %28 : vector<16x32xf32>
    %cst_13 = arith.constant dense<0.000000e+00> : vector<16xf32>
    %30 = vector.multi_reduction <add>, %29, %cst_13 [1] : vector<16x32xf32> to vector<16xf32>
    %31 = vector.shape_cast %30 : vector<16xf32> to vector<16x1xf32>
    %cst_14 = arith.constant 3.200000e+01 : f32
    %32 = vector.broadcast %cst_14 : f32 to vector<16x1xf32>
    %33 = arith.divf %31, %32 : vector<16x1xf32>
    %34 = vector.broadcast %26 : vector<16x1xf32> to vector<16x32xf32>
    %35 = arith.subf %22, %34 : vector<16x32xf32>
    %cst_15 = arith.constant 9.99999974E-6 : f32
    %36 = vector.broadcast %cst_15 : f32 to vector<16x1xf32>
    %37 = arith.addf %33, %36 : vector<16x1xf32>
    %38 = math.rsqrt %37 : vector<16x1xf32>
    %39 = vector.broadcast %38 : vector<16x1xf32> to vector<16x32xf32>
    %40 = arith.mulf %35, %39 : vector<16x32xf32>
    %41 = vector.broadcast %4 : vector<1x32xf32> to vector<16x32xf32>
    %42 = arith.mulf %40, %41 : vector<16x32xf32>
    %43 = vector.broadcast %5 : vector<1x32xf32> to vector<16x32xf32>
    %44 = arith.addf %42, %43 : vector<16x32xf32>
    %c0_16 = arith.constant 0 : index
    %c0_17 = arith.constant 0 : index
    %45 = vector.load %arg5[%c0_16, %c0_17] : memref<16x32xf32, #tpu.memory_space<vmem>>, vector<16x32xf32>
    tpu.vector_store %arg5[%c0_16, %c0_17], %44 {strides = array<i32>} : memref<16x32xf32, #tpu.memory_space<vmem>>, vector<16x32xf32>,
    return
  }
  func.func @transform_0(%arg0: i32) -> (i32, i32) {
    %c0_i32 = arith.constant 0 : i32
    %c0_i32_0 = arith.constant 0 : i32
    %c0_i32_1 = arith.constant 0 : i32
    return %c0_i32, %c0_i32_0 : i32, i32
  }
  func.func @transform_1(%arg0: i32) -> (i32, i32) {
    %c0_i32 = arith.constant 0 : i32
    %c0_i32_0 = arith.constant 0 : i32
    %c0_i32_1 = arith.constant 0 : i32
    return %c0_i32, %c0_i32_0 : i32, i32
  }
  func.func @transform_2(%arg0: i32) -> (i32, i32) {
    %c0_i32 = arith.constant 0 : i32
    %c0_i32_0 = arith.constant 0 : i32
    %c0_i32_1 = arith.constant 0 : i32
    return %c0_i32, %c0_i32_0 : i32, i32
  }
  func.func @transform_3(%arg0: i32) -> (i32, i32) {
    %c0_i32 = arith.constant 0 : i32
    %c0_i32_0 = arith.constant 0 : i32
    %c0_i32_1 = arith.constant 0 : i32
    return %c0_i32, %c0_i32_0 : i32, i32
  }
  func.func @transform_4(%arg0: i32) -> (i32, i32) {
    %c0_i32 = arith.constant 0 : i32
    %c0_i32_0 = arith.constant 0 : i32
    %c0_i32_1 = arith.constant 0 : i32
    return %c0_i32, %c0_i32_0 : i32, i32
  }
}

</mosaic_0001>

<bundles_post_ra>
// kernel: poswise_ffn.1
= control target key start
LH: loop header
LB: loop body
LE: loop exit
PB: predicated region body
PF: predicated region fallthrough
CT: control target
= control target key end

     0   :  { %vm29_vm0 = vcmask 261120   ;;  %s445_s0 = inlined_call_operand.vmem [shape: f32[16,32], index: 0, kind: input, shape index: {}]   ;;  %s446_s1 = inlined_call_operand.vmem [shape: f32[32,64], index: 1, kind: input, shape index: {}]   ;;  %s447_s2 = inlined_call_operand.vmem [shape: f32[64,32], index: 2, kind: input, shape index: {}]   ;;  %s448_s3 = inlined_call_operand.vmem [shape: f32[4,64], index: 3, kind: input, shape index: {}]   ;;  %s449_s4 = inlined_call_operand.hbm [shape: f32[16,32], index: 4, kind: output, shape index: {}]  }
   0x1   :  { %v24_v0 = vld [vmem:[%s446_s1 + $0x18] sm:$0xff]  ;;  %v23_v1 = vld [vmem:[%s446_s1 + $0x10] sm:$0xff]  ;;  %v394_v2 = vld [vmem:[%s445_s0] sm:$0xff] }
   0x2   :  { %294 = vmatprep.subr.mxu0 %v24_v0  ;;  %v22_v3 = vld [vmem:[%s446_s1 + $0x8] sm:$0xff]  ;;  %302 = vmatprep.mubr.msk.f32.mxu0 %vm29_vm0, %v394_v2 }
   0x3   :  { %295 = vmatpush3.msra.mxu0 %v24_v0 }
   0x4   :  { %9 = vsyncpa [#allocation3], 0  ;;  %296 = vmatprep.subr.mxu0 %v23_v1  ;;  %v21_v4 = vld [vmem:[%s446_s1] sm:$0xff]  ;;  %v19_v5 = vld [vmem:[%s445_s0 + $0x8] sm:$0xff]  ;;  %v25_v14 = vlaneseq  ;;  %vm133_vm1 = vcmask 523264  }
   0x5   :  { %297 = vmatpush3.msra.mxu0 %v23_v1  ;;  %v128_v6 = vld [vmem:[%s447_s2 + $0x38] sm:$0xff]  ;;  %v127_v7 = vld [vmem:[%s447_s2 + $0x30] sm:$0xff]  ;;  %v126_v8 = vld [vmem:[%s447_s2 + $0x28] sm:$0xff] }
   0x6   :  { %298 = vmatprep.subr.mxu0 %v22_v3  ;;  %305 = vmatprep.subr.mxu1 %v128_v6  ;;  %v125_v9 = vld [vmem:[%s447_s2 + $0x20] sm:$0xff]  ;;  %v124_v10 = vld [vmem:[%s447_s2 + $0x18] sm:$0xff]  ;;  %v123_v11 = vld [vmem:[%s447_s2 + $0x10] sm:$0xff]  ;;  %v26_v15 = vshrl.u32 %v25_v14, 7 }
   0x7   :  { %299 = vmatpush3.msra.mxu0 %v22_v3  ;;  %306 = vmatpush3.msra.mxu1 %v128_v6  ;;  %v122_v12 = vld [vmem:[%s447_s2 + $0x8] sm:$0xff]  ;;  %v121_v13 = vld [vmem:[%s447_s2] sm:$0xff]  ;;  %s357_s2 = smov [#allocation2]  }
   0x8   :  { %300 = vmatprep.subr.mxu0 %v21_v4  ;;  %307 = vmatprep.subr.mxu1 %v127_v7  ;;  %v27_v16 = vsub.s32 0, %v26_v15  ;;  %v20_v17 = vld [vmem:[%s448_s3] sm:$0xf]  ;;  %v131_v33 = vsub.s32 1, %v26_v15  ;;  %v246_v59 = vsub.s32 2, %v26_v15  ;;  %v252_v60 = vsub.s32 3, %v26_v15 }
   0x9   :  { %301 = vmatpush3.msra.mxu0 %v21_v4  ;;  %308 = vmatpush3.msra.mxu1 %v127_v7  ;;  %s263_s3 = sshll.u32 %s357_s2, 4  ;;  %s264_s3 = int_to_ptr.vmem [resolvable:$true] %s263_s3 }
   0xa   :  { %303 = vmatmul.mubr.msk.f32.vlgmr.msra.gmra.mxu0 %vm29_vm0, %v19_v5  ;;  %309 = vmatprep.subr.mxu1 %v126_v8  ;;  %v28_v18 = vrot.slane %v20_v17, %v27_v16  ;;  %v132_v34 = vrot.slane %v20_v17, %v131_v33  ;;  %v247_v61 = vrot.slane %v20_v17, %v246_v59  ;;  %s335_s17 = scalar_lea.vmem %s264_s3, 256  ;;  %p340_p1 = scmp.lt.s32.totalorder %s264_s3, %s264_s3 }
   0xb   :  { %310 = vmatpush3.msra.mxu1 %v126_v8  ;;  %v253_v63 = vrot.slane %v20_v17, %v252_v60  ;;  %p336_p0 = scmp.ne.s32.totalorder %s264_s3, %s335_s17  ;;  %p341_p2 = scmp.lt.s32.totalorder %s335_s17, %s335_s17 }
   0xc   :  { %311 = vmatprep.subr.mxu1 %v125_v9 }
   0xd   :  { %312 = vmatpush3.msra.mxu1 %v125_v9  ;;  %p342_p3 = por %p341_p2, %p340_p1 }
   0xe   :  { %313 = vmatprep.subr.mxu1 %v124_v10 }
   0xf   :  { %314 = vmatpush3.msra.mxu1 %v124_v10  ;;  %p343_p4 = pnand %p342_p3, %p336_p0 }
  0x10   :  { %315 = vmatprep.subr.mxu1 %v123_v11 }
  0x11   :  { %316 = vmatpush3.msra.mxu1 %v123_v11 }
  0x12   :  { %317 = vmatprep.subr.mxu1 %v122_v12 }
  0x13   :  { %318 = vmatpush3.msra.mxu1 %v122_v12 }
  0x14   :  { %319 = vmatprep.subr.mxu1 %v121_v13 }
  0x15   :  { %320 = vmatpush3.msra.mxu1 %v121_v13 }
  0xca   :  { %v304_v19 = vpop.f32.mrf.mxu0 }
  0xcb   :  { %v108_v20 = vadd.f32 %v304_v19, %v28_v18 }
  0xcc   :  { %v102_v21 = vpop.f32.mrf.mxu0 }
  0xcd   :  { %v114_v22 = vmul.f32 0.70710677, %v108_v20  ;;  %v103_v23 = vadd.f32 %v102_v21, %v28_v18  ;;  %v112_v30 = vmul.f32 0.5, %v108_v20 }
  0xcf   :  { %327 = verf.f32 %v114_v22  ;;  %v113_v24 = vmul.f32 0.70710677, %v103_v23  ;;  %v111_v28 = vmul.f32 0.5, %v103_v23 }
  0xd1   :  { %329 = verf.f32 %v113_v24 }
  0xdc   :  { %v328_v25 = vpop.eup %327 }
  0xdd   :  { %v118_v27 = vadd.f32 1.0, %v328_v25 }
  0xde   :  { %v330_v26 = vpop.eup %329 }
  0xdf   :  { %v117_v29 = vadd.f32 1.0, %v330_v26  ;;  %v120_v32 = vmul.f32 %v118_v27, %v112_v30 }
  0xe1   :  { %v119_v31 = vmul.f32 %v117_v29, %v111_v28 }
  0xe3   :  { %321 = vmatprep.mubr.msk.f32.mxu1 %vm133_vm1, %v119_v31 }
  0xe4   :  { %322 = vmatmul.mubr.msk.f32.vlgmr.msra.gmra.mxu1 %vm133_vm1, %v120_v32 }
 0x1a4   :  { %v323_v35 = vpop.f32.mrf.mxu1 }
 0x1a5   :  { %v212_v37 = vadd.f32 %v323_v35, %v132_v34 }
 0x1a6   :  { %v206_v36 = vpop.f32.mrf.mxu1 }
 0x1a7   :  { %v207_v38 = vadd.f32 %v206_v36, %v132_v34  ;;  %v216_v41 = vadd.f32 %v212_v37, %v19_v5 }
 0x1a9   :  { %v215_v39 = vadd.f32 %v207_v38, %v394_v2  ;;  %v220_v42 = vsel %vm29_vm0, %v216_v41, 0.0 }
 0x1ab   :  { %v217_v40 = vsel %vm29_vm0, %v215_v39, 0.0 }
 0x1ac   :  { %218 = vadd.xlane.f32.xlu0 %v217_v40 }
 0x1b0   :  { %221 = vadd.xlane.f32.xlu0 %v220_v42 }
 0x235   :  { %v219_v43 = vpop.xlane.xlu0 %218 }
 0x236   :  { %v224_v44 = vmul.f32 0.03125, %v219_v43 }
 0x238   :  { %v226_v45 = vsub.f32 %v215_v39, %v224_v44 }
 0x239   :  { %v222_v46 = vpop.xlane.xlu0 %221 }
 0x23a   :  { %v225_v47 = vmul.f32 0.03125, %v222_v46  ;;  %v228_v48 = vmul.f32 %v226_v45, %v226_v45 }
 0x23c   :  { %v227_v49 = vsub.f32 %v216_v41, %v225_v47  ;;  %v230_v50 = vsel %vm29_vm0, %v228_v48, 0.0 }
 0x23d   :  { %231 = vadd.xlane.f32.xlu1 %v230_v50 }
 0x23e   :  { %v229_v51 = vmul.f32 %v227_v49, %v227_v49 }
 0x240   :  { %v233_v52 = vsel %vm29_vm0, %v229_v51, 0.0 }
 0x241   :  { %234 = vadd.xlane.f32.xlu1 %v233_v52 }
 0x2c6   :  { %v232_v53 = vpop.xlane.xlu1 %231 }
 0x2c7   :  { %v236_v54 = vmul.f32 0.03125, %v232_v53 }
 0x2c9   :  { %v238_v55 = vadd.f32 1e-05, %v236_v54 }
 0x2ca   :  { %v235_v56 = vpop.xlane.xlu1 %234 }
 0x2cb   :  { %331 = vrsqrt.f32 %v238_v55  ;;  %v237_v57 = vmul.f32 0.03125, %v235_v56 }
 0x2cd   :  { %v239_v58 = vadd.f32 1e-05, %v237_v57 }
 0x2cf   :  { %333 = vrsqrt.f32 %v239_v58 }
 0x2d8   :  { %v332_v62 = vpop.eup %331 }
 0x2d9   :  { %v242_v0 = vmul.f32 %v332_v62, %v226_v45 }
 0x2db   :  { %v248_v1 = vmul.f32 %v247_v61, %v242_v0 }
 0x2dc   :  { %v334_v2 = vpop.eup %333 }
 0x2dd   :  { %v243_v3 = vmul.f32 %v334_v2, %v227_v49  ;;  %v254_v4 = vadd.f32 %v253_v63, %v248_v1 }
 0x2df   :  { %v249_v5 = vmul.f32 %v247_v61, %v243_v3  ;;  %256 = vst.msk [vmem:[#allocation2] sm:$0xff] %vm29_vm0, %v254_v4 }
 0x2e1   :  { %v255_v6 = vadd.f32 %v253_v63, %v249_v5 }
 0x2e3   :  { %257 = vst.msk [vmem:[#allocation2 + $0x8] sm:$0xff] %vm29_vm0, %v255_v6 }
 0x2e4   :  { %346 = shalt.err (!%p343_p4)
}
 0x2e5   :  { %s358_s18 = smov 128   ;;  %s359_s19 = smov 8  }
 0x2e6   :  { %269 = dma.vmem_to_hbm [thread:$0]  %s264_s3, 256, %s449_s4, [#allocation3], %s358_s18, %s358_s18, %s359_s19  }
 0x2e7   :  { %355 = dma.done.wait [#allocation3], 256  }
 0x2e8   :  { %356 = vsyncadd [#allocation3], 4294967040 }
 0x2e9   :  { %273 = vsyncpa [#allocation3], 1 }

</bundles_post_ra>
